<compile_context>
chip_gen: v7x
topology: tpu7x:2x2x1
jax: 0.10.0
libtpu: 0.0.40
codegen_flags: <defaults>
</compile_context>

<pallas_src>
import functools

import jax
import jax.numpy as jnp
from jax import lax
from jax.experimental import pallas as pl
from jax.experimental.pallas import tpu as pltpu

LN_EPS = 1e-5  # torch.nn.LayerNorm default


def _layer_norm(x2d, w, b):
    mu = jnp.mean(x2d, axis=-1, keepdims=True)
    var = jnp.mean(jnp.square(x2d - mu), axis=-1, keepdims=True)
    return (x2d - mu) * lax.rsqrt(var + LN_EPS) * w + b


def _transformer_block_kernel(x_ref, mask_ref, wqkv_ref, wout_ref,
                              lnw_ref, lnb_ref, w1_ref, b1_ref, a_ref,
                              w2_ref, b2_ref, out_ref, *, num_heads):
    _, L, D = x_ref.shape
    H = num_heads
    dh = D // H

    x = x_ref[0]                                   # (L, D) f32
    x_bf = x.astype(jnp.bfloat16)

    # Fused qkv projection on the MXU (bf16 in, f32 accumulate), then split.
    qkv = jnp.dot(x_bf, wqkv_ref[...], preferred_element_type=jnp.float32)  # (L, 3D)
    q2d = qkv[:, :D]
    k2d = qkv[:, D:2 * D]
    v2d = qkv[:, 2 * D:]

    scale = 1.0 / (D ** 0.5)                       # 1/sqrt(d_model), as in torch code

    # Per-head row sums on the VPU (no pooling matmuls).
    qsum = jnp.sum(q2d.reshape(L, H, dh), axis=-1) * scale   # (L, H)
    ksum = jnp.sum(k2d.reshape(L, H, dh), axis=-1)           # (L, H)

    # Scores with the key axis on lanes: e[lq, h, lk] = qsum[lq,h]*ksum[lk,h] + mask[lq,lk]
    mask = mask_ref[...]                                     # (L, L), lane-dense
    ksum_t = ksum.T                                          # (H, Lk), tiny transpose
    e = qsum[:, :, None] * ksum_t[None, :, :] + mask[:, None, :]   # (Lq, H, Lk)

    # Only the diagonal of softmax(e) is ever used -> row stats + diagonal score.
    m = jnp.max(e, axis=-1)                                  # (Lq, H)
    s = jnp.sum(jnp.exp(e - m[:, :, None]), axis=-1)         # (Lq, H)

    row = lax.broadcasted_iota(jnp.int32, (L, L), 0)
    col = lax.broadcasted_iota(jnp.int32, (L, L), 1)
    mask_diag = jnp.sum(jnp.where(row == col, mask, 0.0), axis=-1)   # (L,)
    e_diag = qsum * ksum + mask_diag[:, None]                # (L, H)

    diag = jnp.exp(e_diag - m) * pl.reciprocal(s, approx=True)       # (L, H)
    # torch.nan_to_num: NaN -> 0 (fully-masked rows).
    # TODO(synk): torch.nan_to_num also clamps +/-inf; not reachable with a causal mask.
    diag = jnp.where(jnp.isnan(diag), 0.0, diag)

    # out_att[l, h*dh + j] = att_diag[l, h] * v[l, h*dh + j]  (VPU broadcast, no expand matmul)
    out_att = (v2d.reshape(L, H, dh) * diag[:, :, None]).reshape(L, D)

    # to_out (no bias)
    att_o = jnp.dot(out_att.astype(jnp.bfloat16), wout_ref[...],
                    preferred_element_type=jnp.float32)      # (L, D)

    lnw = lnw_ref[...]
    lnb = lnb_ref[...]
    h1 = _layer_norm(att_o + x, lnw, lnb)                    # layer_norm(att + x), f32

    # MLP: Linear(D, 4D) -> PReLU(init=0.01) -> Dropout -> Linear(4D, D)
    # TODO(synk): Dropout is treated as identity (inference / eval mode).
    a = a_ref[0]                                             # PReLU scalar from SMEM
    m1 = jnp.dot(h1.astype(jnp.bfloat16), w1_ref[...],
                 preferred_element_type=jnp.float32) + b1_ref[...]
    m1 = jnp.where(m1 >= 0, m1, m1 * a)
    m2 = jnp.dot(m1.astype(jnp.bfloat16), w2_ref[...],
                 preferred_element_type=jnp.float32) + b2_ref[...]

    out_ref[0] = _layer_norm(m2 + h1, lnw, lnb)              # same LN params again


def _final_ln_kernel(x_ref, w_ref, b_ref, out_ref):
    out_ref[0] = _layer_norm(x_ref[0], w_ref[...], b_ref[...])


def transformer_block(x, mask, params, num_heads):
    B, L, D = x.shape
    assert D % num_heads == 0

    # Pre-transpose weights to (in, out) and cast to bf16 for MXU-native matmuls.
    wqkv_t = params["wqkv"].T.astype(jnp.bfloat16)    # (D, 3D)
    wout_t = params["wout"].T.astype(jnp.bfloat16)    # (D, D)
    w1_t = params["w1"].T.astype(jnp.bfloat16)        # (D, 4D)
    w2_t = params["w2"].T.astype(jnp.bfloat16)        # (4D, D)

    mask2 = mask.astype(jnp.float32)                  # (L, L), key axis lane-dense
    a_smem = params["a"].reshape((1,)).astype(jnp.float32)

    kernel = functools.partial(_transformer_block_kernel, num_heads=num_heads)
    act_map = lambda b: (b, 0, 0)
    const2 = lambda b: (0, 0)

    return pl.pallas_call(
        kernel,
        out_shape=jax.ShapeDtypeStruct((B, L, D), jnp.float32),
        grid=(B,),
        in_specs=[
            pl.BlockSpec((1, L, D), act_map),                    # x (streamed)
            pl.BlockSpec((L, L), const2),                        # mask (resident)
            pl.BlockSpec((D, 3 * D), const2),                    # wqkv^T (resident)
            pl.BlockSpec((D, D), const2),                        # wout^T
            pl.BlockSpec((1, D), const2),                        # ln weight
            pl.BlockSpec((1, D), const2),                        # ln bias
            pl.BlockSpec((D, 4 * D), const2),                    # w1^T
            pl.BlockSpec((1, 4 * D), const2),                    # b1
            pl.BlockSpec(memory_space=pltpu.MemorySpace.SMEM),   # PReLU a (scalar)
            pl.BlockSpec((4 * D, D), const2),                    # w2^T
            pl.BlockSpec((1, D), const2),                        # b2
        ],
        out_specs=pl.BlockSpec((1, L, D), act_map),
        input_output_aliases={0: 0},                             # x updated in place
        compiler_params=pltpu.CompilerParams(
            dimension_semantics=("parallel",),
            vmem_limit_bytes=48 * 1024 * 1024),
    )(x, mask2, wqkv_t, wout_t, params["lnw"], params["lnb"],
      w1_t, params["b1"], a_smem, w2_t, params["b2"])


def final_layer_norm(x, w, b):
    B, L, D = x.shape
    act_map = lambda b: (b, 0, 0)
    const2 = lambda b: (0, 0)
    return pl.pallas_call(
        _final_ln_kernel,
        out_shape=jax.ShapeDtypeStruct((B, L, D), jnp.float32),
        grid=(B,),
        in_specs=[pl.BlockSpec((1, L, D), act_map),
                  pl.BlockSpec((1, D), const2),
                  pl.BlockSpec((1, D), const2)],
        out_specs=pl.BlockSpec((1, L, D), act_map),
        input_output_aliases={0: 0},
        compiler_params=pltpu.CompilerParams(dimension_semantics=("parallel",)),
    )(x, w, b)


def transformer_encoder(x, mask, params, num_heads):
    for layer_p in params["layers"]:
        x = transformer_block(x, mask, layer_p, num_heads)
    return final_layer_norm(x, params["lnw"], params["lnb"])


def init_params(key, d_model, num_layers):
    layers = []
    s = 0.05
    for _ in range(num_layers):
        key, *ks = jax.random.split(key, 7)
        layers.append({
            "wqkv": s * jax.random.normal(ks[0], (3 * d_model, d_model), jnp.float32),
            "wout": s * jax.random.normal(ks[1], (d_model, d_model), jnp.float32),
            "lnw": jnp.ones((1, d_model), jnp.float32),
            "lnb": jnp.zeros((1, d_model), jnp.float32),
            "w1": s * jax.random.normal(ks[2], (4 * d_model, d_model), jnp.float32),
            "b1": s * jax.random.normal(ks[3], (1, 4 * d_model), jnp.float32),
            "a": jnp.full((1, 1), 0.01, jnp.float32),   # PReLU(init=0.01)
            "w2": s * jax.random.normal(ks[4], (d_model, 4 * d_model), jnp.float32),
            "b2": s * jax.random.normal(ks[5], (1, d_model), jnp.float32),
        })
    return {
        "layers": layers,
        "lnw": jnp.ones((1, d_model), jnp.float32),
        "lnb": jnp.zeros((1, d_model), jnp.float32),
    }


if __name__ == "__main__":
    B, L, D, H, NUM_LAYERS = 2, 8, 32, 4, 2
    key = jax.random.PRNGKey(0)
    kx, kp = jax.random.split(key)

    x = jax.random.normal(kx, (B, L, D), jnp.float32)
    causal = jnp.tril(jnp.ones((L, L), jnp.float32))
    mask = jnp.where(causal > 0, 0.0, -jnp.inf).astype(jnp.float32)

    params = init_params(kp, D, NUM_LAYERS)

    out = transformer_encoder(x, mask, params, H)
    out = jax.block_until_ready(out)

    assert out.shape == (B, L, D)
    assert bool(jnp.all(jnp.isfinite(out)))
    print("KERNEL_OK")
</pallas_src>

<mosaic_0001>
module attributes {stable_mosaic.version = 11 : i64} {
  func.func @_transformer_block_kernel(%arg0: i32, %arg1: memref<1x8x32xf32, #tpu.memory_space<vmem>>, %arg2: memref<8x8xf32, #tpu.memory_space<vmem>>, %arg3: memref<32x96xbf16, #tpu.memory_space<vmem>>, %arg4: memref<32x32xbf16, #tpu.memory_space<vmem>>, %arg5: memref<1x32xf32, #tpu.memory_space<vmem>>, %arg6: memref<1x32xf32, #tpu.memory_space<vmem>>, %arg7: memref<32x128xbf16, #tpu.memory_space<vmem>>, %arg8: memref<1x128xf32, #tpu.memory_space<vmem>>, %arg9: memref<1xf32, #tpu.memory_space<smem>>, %arg10: memref<128x32xbf16, #tpu.memory_space<vmem>>, %arg11: memref<1x32xf32, #tpu.memory_space<vmem>>, %arg12: memref<1x8x32xf32, #tpu.memory_space<vmem>>) attributes {dimension_semantics = [#tpu.dimension_semantics<parallel>], iteration_bounds = array<i64: 2>, scalar_prefetch = 0 : i64, scratch_operands = 0 : i64, tpu.core_type = #tpu.core_type<tc>, window_params = [{transform_indices = @transform_0, window_bounds = array<i64: 1, 8, 32>}, {pipeline_mode = #tpu.pipeline_mode<synchronous>, transform_indices = @transform_1, window_bounds = array<i64: 8, 8>}, {pipeline_mode = #tpu.pipeline_mode<synchronous>, transform_indices = @transform_2, window_bounds = array<i64: 32, 96>}, {pipeline_mode = #tpu.pipeline_mode<synchronous>, transform_indices = @transform_3, window_bounds = array<i64: 32, 32>}, {pipeline_mode = #tpu.pipeline_mode<synchronous>, transform_indices = @transform_4, window_bounds = array<i64: 1, 32>}, {pipeline_mode = #tpu.pipeline_mode<synchronous>, transform_indices = @transform_5, window_bounds = array<i64: 1, 32>}, {pipeline_mode = #tpu.pipeline_mode<synchronous>, transform_indices = @transform_6, window_bounds = array<i64: 32, 128>}, {pipeline_mode = #tpu.pipeline_mode<synchronous>, transform_indices = @transform_7, window_bounds = array<i64: 1, 128>}, {transform_indices = @transform_8, window_bounds = array<i64: 1>}, {pipeline_mode = #tpu.pipeline_mode<synchronous>, transform_indices = @transform_9, window_bounds = array<i64: 128, 32>}, {pipeline_mode = #tpu.pipeline_mode<synchronous>, transform_indices = @transform_10, window_bounds = array<i64: 1, 32>}, {transform_indices = @transform_11, window_bounds = array<i64: 1, 8, 32>}]} {
    %c0 = arith.constant 0 : index
    %c0_0 = arith.constant 0 : index
    %c0_1 = arith.constant 0 : index
    %0 = vector.load %arg1[%c0, %c0_0, %c0_1] : memref<1x8x32xf32, #tpu.memory_space<vmem>>, vector<1x8x32xf32>
    %1 = vector.shape_cast %0 : vector<1x8x32xf32> to vector<8x32xf32>
    %2 = arith.truncf %1 : vector<8x32xf32> to vector<8x32xbf16>
    %c0_2 = arith.constant 0 : index
    %c0_3 = arith.constant 0 : index
    %3 = vector.load %arg3[%c0_2, %c0_3] : memref<32x96xbf16, #tpu.memory_space<vmem>>, vector<32x96xbf16>
    %cst = arith.constant dense<0.000000e+00> : vector<8x96xf32>
    %4 = tpu.matmul %2, %3, %cst {dimension_numbers = #tpu.dot_dimension_numbers<[1], [0], [0], [1], [0, 0, 1, 1], [], []>} : vector<8x32xbf16>, vector<32x96xbf16>, vector<8x96xf32> -> vector<8x96xf32>
    %5 = vector.extract_strided_slice %4 {offsets = [0, 0], sizes = [8, 32], strides = [1, 1]} : vector<8x96xf32> to vector<8x32xf32>
    %6 = vector.extract_strided_slice %4 {offsets = [0, 32], sizes = [8, 32], strides = [1, 1]} : vector<8x96xf32> to vector<8x32xf32>
    %7 = vector.extract_strided_slice %4 {offsets = [0, 64], sizes = [8, 32], strides = [1, 1]} : vector<8x96xf32> to vector<8x32xf32>
    %8 = vector.shape_cast %5 : vector<8x32xf32> to vector<8x4x8xf32>
    %cst_4 = arith.constant dense<0.000000e+00> : vector<8x4xf32>
    %9 = vector.multi_reduction <add>, %8, %cst_4 [2] : vector<8x4x8xf32> to vector<8x4xf32>
    %cst_5 = arith.constant 0.176776692 : f32
    %10 = vector.broadcast %cst_5 : f32 to vector<8x4xf32>
    %11 = arith.mulf %9, %10 : vector<8x4xf32>
    %12 = vector.shape_cast %6 : vector<8x32xf32> to vector<8x4x8xf32>
    %cst_6 = arith.constant dense<0.000000e+00> : vector<8x4xf32>
    %13 = vector.multi_reduction <add>, %12, %cst_6 [2] : vector<8x4x8xf32> to vector<8x4xf32>
    %c0_7 = arith.constant 0 : index
    %c0_8 = arith.constant 0 : index
    %14 = vector.load %arg2[%c0_7, %c0_8] : memref<8x8xf32, #tpu.memory_space<vmem>>, vector<8x8xf32>
    %15 = tpu.transpose %13, [1, 0] : vector<8x4xf32> -> vector<4x8xf32>
    %16 = vector.shape_cast %11 : vector<8x4xf32> to vector<8x4x1xf32>
    %17 = vector.shape_cast %15 : vector<4x8xf32> to vector<1x4x8xf32>
    %18 = vector.broadcast %16 : vector<8x4x1xf32> to vector<8x4x8xf32>
    %19 = vector.broadcast %17 : vector<1x4x8xf32> to vector<8x4x8xf32>
    %20 = arith.mulf %18, %19 : vector<8x4x8xf32>
    %21 = vector.shape_cast %14 : vector<8x8xf32> to vector<8x1x8xf32>
    %22 = vector.broadcast %21 : vector<8x1x8xf32> to vector<8x4x8xf32>
    %23 = arith.addf %20, %22 : vector<8x4x8xf32>
    %cst_9 = arith.constant dense<0xFF800000> : vector<8x4xf32>
    %24 = vector.multi_reduction <maximumf>, %23, %cst_9 [2] : vector<8x4x8xf32> to vector<8x4xf32>
    %25 = vector.shape_cast %24 : vector<8x4xf32> to vector<8x4x1xf32>
    %26 = vector.broadcast %25 : vector<8x4x1xf32> to vector<8x4x8xf32>
    %27 = arith.subf %23, %26 : vector<8x4x8xf32>
    %28 = math.exp %27 : vector<8x4x8xf32>
    %cst_10 = arith.constant dense<0.000000e+00> : vector<8x4xf32>
    %29 = vector.multi_reduction <add>, %28, %cst_10 [2] : vector<8x4x8xf32> to vector<8x4xf32>
    %30 = tpu.iota {dimensions = array<i32: 0>} : vector<8x8xi32>
    %31 = tpu.iota {dimensions = array<i32: 1>} : vector<8x8xi32>
    %32 = arith.cmpi eq, %30, %31 : vector<8x8xi32>
    %cst_11 = arith.constant 0.000000e+00 : f32
    %33 = vector.broadcast %cst_11 : f32 to vector<8x8xf32>
    %34 = arith.select %32, %14, %33 : vector<8x8xi1>, vector<8x8xf32>
    %cst_12 = arith.constant dense<0.000000e+00> : vector<8xf32>
    %35 = vector.multi_reduction <add>, %34, %cst_12 [1] : vector<8x8xf32> to vector<8xf32>
    %36 = arith.mulf %11, %13 : vector<8x4xf32>
    %37 = vector.shape_cast %35 : vector<8xf32> to vector<8x1xf32>
    %38 = vector.broadcast %37 : vector<8x1xf32> to vector<8x4xf32>
    %39 = arith.addf %36, %38 : vector<8x4xf32>
    %40 = arith.subf %39, %24 : vector<8x4xf32>
    %41 = math.exp %40 : vector<8x4xf32>
    %42 = tpu.reciprocal %29 {approx = true} : vector<8x4xf32> -> vector<8x4xf32>
    %43 = arith.mulf %41, %42 : vector<8x4xf32>
    %44 = arith.cmpf one, %43, %43 : vector<8x4xf32>
    %cst_13 = arith.constant 0.000000e+00 : f32
    %45 = vector.broadcast %cst_13 : f32 to vector<8x4xf32>
    %46 = arith.select %44, %45, %43 : vector<8x4xi1>, vector<8x4xf32>
    %47 = vector.shape_cast %7 : vector<8x32xf32> to vector<8x4x8xf32>
    %48 = vector.shape_cast %46 : vector<8x4xf32> to vector<8x4x1xf32>
    %49 = vector.broadcast %48 : vector<8x4x1xf32> to vector<8x4x8xf32>
    %50 = arith.mulf %47, %49 : vector<8x4x8xf32>
    %51 = vector.shape_cast %50 : vector<8x4x8xf32> to vector<8x32xf32>
    %52 = arith.truncf %51 : vector<8x32xf32> to vector<8x32xbf16>
    %c0_14 = arith.constant 0 : index
    %c0_15 = arith.constant 0 : index
    %53 = vector.load %arg4[%c0_14, %c0_15] : memref<32x32xbf16, #tpu.memory_space<vmem>>, vector<32x32xbf16>
    %cst_16 = arith.constant dense<0.000000e+00> : vector<8x32xf32>
    %54 = tpu.matmul %52, %53, %cst_16 {dimension_numbers = #tpu.dot_dimension_numbers<[1], [0], [0], [1], [0, 0, 1, 1], [], []>} : vector<8x32xbf16>, vector<32x32xbf16>, vector<8x32xf32> -> vector<8x32xf32>
    %c0_17 = arith.constant 0 : index
    %c0_18 = arith.constant 0 : index
    %55 = vector.load %arg5[%c0_17, %c0_18] : memref<1x32xf32, #tpu.memory_space<vmem>>, vector<1x32xf32>
    %c0_19 = arith.constant 0 : index
    %c0_20 = arith.constant 0 : index
    %56 = vector.load %arg6[%c0_19, %c0_20] : memref<1x32xf32, #tpu.memory_space<vmem>>, vector<1x32xf32>
    %57 = arith.addf %54, %1 : vector<8x32xf32>
    %cst_21 = arith.constant dense<0.000000e+00> : vector<8xf32>
    %58 = vector.multi_reduction <add>, %57, %cst_21 [1] : vector<8x32xf32> to vector<8xf32>
    %59 = vector.shape_cast %58 : vector<8xf32> to vector<8x1xf32>
    %cst_22 = arith.constant 3.200000e+01 : f32
    %60 = vector.broadcast %cst_22 : f32 to vector<8x1xf32>
    %61 = arith.divf %59, %60 : vector<8x1xf32>
    %62 = vector.broadcast %61 : vector<8x1xf32> to vector<8x32xf32>
    %63 = arith.subf %57, %62 : vector<8x32xf32>
    %64 = arith.mulf %63, %63 : vector<8x32xf32>
    %cst_23 = arith.constant dense<0.000000e+00> : vector<8xf32>
    %65 = vector.multi_reduction <add>, %64, %cst_23 [1] : vector<8x32xf32> to vector<8xf32>
    %66 = vector.shape_cast %65 : vector<8xf32> to vector<8x1xf32>
    %cst_24 = arith.constant 3.200000e+01 : f32
    %67 = vector.broadcast %cst_24 : f32 to vector<8x1xf32>
    %68 = arith.divf %66, %67 : vector<8x1xf32>
    %69 = vector.broadcast %61 : vector<8x1xf32> to vector<8x32xf32>
    %70 = arith.subf %57, %69 : vector<8x32xf32>
    %cst_25 = arith.constant 9.99999974E-6 : f32
    %71 = vector.broadcast %cst_25 : f32 to vector<8x1xf32>
    %72 = arith.addf %68, %71 : vector<8x1xf32>
    %73 = math.rsqrt %72 : vector<8x1xf32>
    %74 = vector.broadcast %73 : vector<8x1xf32> to vector<8x32xf32>
    %75 = arith.mulf %70, %74 : vector<8x32xf32>
    %76 = vector.broadcast %55 : vector<1x32xf32> to vector<8x32xf32>
    %77 = arith.mulf %75, %76 : vector<8x32xf32>
    %78 = vector.broadcast %56 : vector<1x32xf32> to vector<8x32xf32>
    %79 = arith.addf %77, %78 : vector<8x32xf32>
    %c0_26 = arith.constant 0 : index
    %80 = memref.load %arg9[%c0_26] : memref<1xf32, #tpu.memory_space<smem>>
    %81 = arith.truncf %79 : vector<8x32xf32> to vector<8x32xbf16>
    %c0_27 = arith.constant 0 : index
    %c0_28 = arith.constant 0 : index
    %82 = vector.load %arg7[%c0_27, %c0_28] : memref<32x128xbf16, #tpu.memory_space<vmem>>, vector<32x128xbf16>
    %cst_29 = arith.constant dense<0.000000e+00> : vector<8x128xf32>
    %83 = tpu.matmul %81, %82, %cst_29 {dimension_numbers = #tpu.dot_dimension_numbers<[1], [0], [0], [1], [0, 0, 1, 1], [], []>} : vector<8x32xbf16>, vector<32x128xbf16>, vector<8x128xf32> -> vector<8x128xf32>
    %c0_30 = arith.constant 0 : index
    %c0_31 = arith.constant 0 : index
    %84 = vector.load %arg8[%c0_30, %c0_31] : memref<1x128xf32, #tpu.memory_space<vmem>>, vector<1x128xf32>
    %85 = vector.broadcast %84 : vector<1x128xf32> to vector<8x128xf32>
    %86 = arith.addf %83, %85 : vector<8x128xf32>
    %cst_32 = arith.constant 0.000000e+00 : f32
    %87 = vector.broadcast %cst_32 : f32 to vector<8x128xf32>
    %88 = arith.cmpf oge, %86, %87 : vector<8x128xf32>
    %89 = vector.broadcast %80 : f32 to vector<8x128xf32>
    %90 = arith.mulf %86, %89 : vector<8x128xf32>
    %91 = arith.select %88, %86, %90 : vector<8x128xi1>, vector<8x128xf32>
    %92 = arith.truncf %91 : vector<8x128xf32> to vector<8x128xbf16>
    %c0_33 = arith.constant 0 : index
    %c0_34 = arith.constant 0 : index
    %93 = vector.load %arg10[%c0_33, %c0_34] : memref<128x32xbf16, #tpu.memory_space<vmem>>, vector<128x32xbf16>
    %cst_35 = arith.constant dense<0.000000e+00> : vector<8x32xf32>
    %94 = tpu.matmul %92, %93, %cst_35 {dimension_numbers = #tpu.dot_dimension_numbers<[1], [0], [0], [1], [0, 0, 1, 1], [], []>} : vector<8x128xbf16>, vector<128x32xbf16>, vector<8x32xf32> -> vector<8x32xf32>
    %c0_36 = arith.constant 0 : index
    %c0_37 = arith.constant 0 : index
    %95 = vector.load %arg11[%c0_36, %c0_37] : memref<1x32xf32, #tpu.memory_space<vmem>>, vector<1x32xf32>
    %96 = vector.broadcast %95 : vector<1x32xf32> to vector<8x32xf32>
    %97 = arith.addf %94, %96 : vector<8x32xf32>
    %98 = arith.addf %97, %79 : vector<8x32xf32>
    %cst_38 = arith.constant dense<0.000000e+00> : vector<8xf32>
    %99 = vector.multi_reduction <add>, %98, %cst_38 [1] : vector<8x32xf32> to vector<8xf32>
    %100 = vector.shape_cast %99 : vector<8xf32> to vector<8x1xf32>
    %cst_39 = arith.constant 3.200000e+01 : f32
    %101 = vector.broadcast %cst_39 : f32 to vector<8x1xf32>
    %102 = arith.divf %100, %101 : vector<8x1xf32>
    %103 = vector.broadcast %102 : vector<8x1xf32> to vector<8x32xf32>
    %104 = arith.subf %98, %103 : vector<8x32xf32>
    %105 = arith.mulf %104, %104 : vector<8x32xf32>
    %cst_40 = arith.constant dense<0.000000e+00> : vector<8xf32>
    %106 = vector.multi_reduction <add>, %105, %cst_40 [1] : vector<8x32xf32> to vector<8xf32>
    %107 = vector.shape_cast %106 : vector<8xf32> to vector<8x1xf32>
    %cst_41 = arith.constant 3.200000e+01 : f32
    %108 = vector.broadcast %cst_41 : f32 to vector<8x1xf32>
    %109 = arith.divf %107, %108 : vector<8x1xf32>
    %110 = vector.broadcast %102 : vector<8x1xf32> to vector<8x32xf32>
    %111 = arith.subf %98, %110 : vector<8x32xf32>
    %cst_42 = arith.constant 9.99999974E-6 : f32
    %112 = vector.broadcast %cst_42 : f32 to vector<8x1xf32>
    %113 = arith.addf %109, %112 : vector<8x1xf32>
    %114 = math.rsqrt %113 : vector<8x1xf32>
    %115 = vector.broadcast %114 : vector<8x1xf32> to vector<8x32xf32>
    %116 = arith.mulf %111, %115 : vector<8x32xf32>
    %117 = vector.broadcast %55 : vector<1x32xf32> to vector<8x32xf32>
    %118 = arith.mulf %116, %117 : vector<8x32xf32>
    %119 = vector.broadcast %56 : vector<1x32xf32> to vector<8x32xf32>
    %120 = arith.addf %118, %119 : vector<8x32xf32>
    %c0_43 = arith.constant 0 : index
    %c0_44 = arith.constant 0 : index
    %c0_45 = arith.constant 0 : index
    %121 = vector.load %arg12[%c0_43, %c0_44, %c0_45] : memref<1x8x32xf32, #tpu.memory_space<vmem>>, vector<1x8x32xf32>
    %122 = vector.shape_cast %121 : vector<1x8x32xf32> to vector<8x32xf32>
    %123 = vector.shape_cast %120 : vector<8x32xf32> to vector<1x8x32xf32>
    tpu.vector_store %arg12[%c0_43, %c0_44, %c0_45], %123 {strides = array<i32>} : memref<1x8x32xf32, #tpu.memory_space<vmem>>, vector<1x8x32xf32>,
    return
  }
  func.func @transform_0(%arg0: i32) -> (i32, i32, i32) {
    %c0_i32 = arith.constant 0 : i32
    %c0_i32_0 = arith.constant 0 : i32
    %c0_i32_1 = arith.constant 0 : i32
    return %arg0, %c0_i32, %c0_i32_0 : i32, i32, i32
  }
  func.func @transform_1(%arg0: i32) -> (i32, i32) {
    %c0_i32 = arith.constant 0 : i32
    %c0_i32_0 = arith.constant 0 : i32
    %c0_i32_1 = arith.constant 0 : i32
    return %c0_i32, %c0_i32_0 : i32, i32
  }
  func.func @transform_2(%arg0: i32) -> (i32, i32) {
    %c0_i32 = arith.constant 0 : i32
    %c0_i32_0 = arith.constant 0 : i32
    %c0_i32_1 = arith.constant 0 : i32
    return %c0_i32, %c0_i32_0 : i32, i32
  }
  func.func @transform_3(%arg0: i32) -> (i32, i32) {
    %c0_i32 = arith.constant 0 : i32
    %c0_i32_0 = arith.constant 0 : i32
    %c0_i32_1 = arith.constant 0 : i32
    return %c0_i32, %c0_i32_0 : i32, i32
  }
  func.func @transform_4(%arg0: i32) -> (i32, i32) {
    %c0_i32 = arith.constant 0 : i32
    %c0_i32_0 = arith.constant 0 : i32
    %c0_i32_1 = arith.constant 0 : i32
    return %c0_i32, %c0_i32_0 : i32, i32
  }
  func.func @transform_5(%arg0: i32) -> (i32, i32) {
    %c0_i32 = arith.constant 0 : i32
    %c0_i32_0 = arith.constant 0 : i32
    %c0_i32_1 = arith.constant 0 : i32
    return %c0_i32, %c0_i32_0 : i32, i32
  }
  func.func @transform_6(%arg0: i32) -> (i32, i32) {
    %c0_i32 = arith.constant 0 : i32
    %c0_i32_0 = arith.constant 0 : i32
    %c0_i32_1 = arith.constant 0 : i32
    return %c0_i32, %c0_i32_0 : i32, i32
  }
  func.func @transform_7(%arg0: i32) -> (i32, i32) {
    %c0_i32 = arith.constant 0 : i32
    %c0_i32_0 = arith.constant 0 : i32
    %c0_i32_1 = arith.constant 0 : i32
    return %c0_i32, %c0_i32_0 : i32, i32
  }
  func.func @transform_8(%arg0: i32) -> i32 {
    %c0_i32 = arith.constant 0 : i32
    %c0_i32_0 = arith.constant 0 : i32
    return %c0_i32 : i32
  }
  func.func @transform_9(%arg0: i32) -> (i32, i32) {
    %c0_i32 = arith.constant 0 : i32
    %c0_i32_0 = arith.constant 0 : i32
    %c0_i32_1 = arith.constant 0 : i32
    return %c0_i32, %c0_i32_0 : i32, i32
  }
  func.func @transform_10(%arg0: i32) -> (i32, i32) {
    %c0_i32 = arith.constant 0 : i32
    %c0_i32_0 = arith.constant 0 : i32
    %c0_i32_1 = arith.constant 0 : i32
    return %c0_i32, %c0_i32_0 : i32, i32
  }
  func.func @transform_11(%arg0: i32) -> (i32, i32, i32) {
    %c0_i32 = arith.constant 0 : i32
    %c0_i32_0 = arith.constant 0 : i32
    %c0_i32_1 = arith.constant 0 : i32
    return %arg0, %c0_i32, %c0_i32_0 : i32, i32, i32
  }
}

</mosaic_0001>

<bundles_post_ra>
// kernel: tpu_custom_call.1
= control target key start
LH: loop header
LB: loop body
LE: loop exit
PB: predicated region body
PF: predicated region fallthrough
CT: control target
= control target key end

     0   :  { %s2566_s0 = inlined_call_operand.hbm [shape: f32[2,8,32], index: 0, kind: input, shape index: {}, may-alias: {0,11}]   ;;  %s2567_s1 = inlined_call_operand.vmem [shape: f32[8,8], index: 1, kind: input, shape index: {}]   ;;  %s2568_s2 = inlined_call_operand.vmem [shape: bf16[32,96], index: 2, kind: input, shape index: {}]   ;;  %s2569_s3 = inlined_call_operand.vmem [shape: bf16[32,32], index: 3, kind: input, shape index: {}]   ;;  %s2570_s4 = inlined_call_operand.vmem [shape: f32[1,32], index: 4, kind: input, shape index: {}]   ;;  %s2571_s5 = inlined_call_operand.vmem [shape: f32[1,32], index: 5, kind: input, shape index: {}]   ;;  %s2572_s6 = inlined_call_operand.vmem [shape: bf16[32,128], index: 6, kind: input, shape index: {}]   ;;  %s2573_s7 = inlined_call_operand.vmem [shape: f32[1,128], index: 7, kind: input, shape index: {}]   ;;  %s2574_s8 = inlined_call_operand.<no memory space> [shape: f32[1], index: 8, kind: input, shape index: {}]   ;;  %s2575_s9 = inlined_call_operand.vmem [shape: bf16[128,32], index: 9, kind: input, shape index: {}]   ;;  %s2576_s10 = inlined_call_operand.vmem [shape: f32[1,32], index: 10, kind: input, shape index: {}]   ;;  %s2577_s11 = inlined_call_operand.hbm [shape: f32[2,8,32], index: 11, kind: output, shape index: {}, may-alias: {0,11}]  }
   0x1   :  { %16 = sst [smem:[#allocation2]] %s2574_s8 }
   0x2   :  { %17 = vsyncpa [#allocation4], 0 }
   0x3   :  { %19 = vsyncpa [#allocation4 + $0x1], 0 }
   0x4   :  { %20 = vsyncpa [#allocation5], 0 }
   0x5   :  { %22 = vsyncpa [#allocation5 + $0x1], 0  ;;  %s2060_s19 = smov 0   ;;  %s2062_s20 = smov 0  }
   0x6   :  { %s2064_s21 = smov 0   ;;  %s2066_s22 = smov 0  }
   0x7 LB: > { %s2081_s8 = sadd.s32 4294967295, %s1979_s22   ;;  %s1658_s23 = sadd.s32 4294967294, %s1979_s22   ;;  %s1979_s22 = sphi %s2066_s22, %s2594_s22   ;;  %s1975_s21 = sphi %s2064_s21, %s2593_s21   ;;  %s1971_s20 = sphi %s2062_s20, %s2592_s20   ;;  %s1967_s19 = sphi %s2060_s19, %s2591_s19  }
   0x8   : > { %s2085_s24 = sadd.s32 1, %s1979_s22   ;;  %s35_s25 = sadd.s32 1, %s1975_s21 }
   0x9   : > { %s32_s26 = ssub.s32 %s1979_s22, %s2085_s24  ;;  %p42_p0 = scmp.ne.s32.totalorder %s1975_s21, %s1971_s20 }
   0xa   : > { %p33_p1 = scmp.eq.s32.totalorder %s32_s26, 0  ;;  %p43_p2 = scmp.eq.s32.totalorder %s1979_s22, 0 }
   0xb   : > { %p48_p3 = scmp.ne.s32.totalorder %s1971_s20, %s1967_s19  ;;  %p49_p4 = scmp.eq.s32.totalorder %s2081_s8, 0 }
   0xc   : > { %s2097_s27 = scalar_select %p33_p1, %s1975_s21, %s35_s25  }
   0xd   : > { %p2099_p5 = por %p43_p2, %p42_p0  ;;  %p2103_p6 = por %p49_p4, %p48_p3 }
   0xe   : > { %2579 = sst [smem:[#allocation9_spill]] %s2097_s27  ;;  %p282_p7 = scmp.eq.s32.totalorder %s2081_s8, 1 }
   0xf   : > { %p288_p8 = scmp.eq.s32.totalorder %s1658_s23, 1  ;;  %p1765_p10 = scmp.lt.s32.totalorder %s1979_s22, 2 }
  0x10   : > { %p2110_p11 = por %p282_p7, %p42_p0  ;;  %s338_s13 = sand.u32 1, %s1975_s21  }
  0x11   : > { %p2114_p12 = por %p288_p8, %p48_p3  ;;  %s1662_s14 = sshll.u32 %s1979_s22, 7 }
  0x12   : > { %s2582_s30 = scalar_select %p2110_p11, 1, 0 }
  0x13   : > { %s2583_s12 = scalar_select %p2114_p12, 1, 0 }
  0x14   : > { %s1661_s15 = sshll.u32 %s338_s13, 3  ;;  %s2123_s18 = scalar_lea.hbm %s2566_s0, %s1662_s14 }
  0x15   : > { %s342_s23 = scalar_lea.vmem [#allocation3], %s1661_s15  ;;  %p2127_p13 = pnand %p1765_p10, %p2099_p5 }
  0x16   : > { %s349_s25 = sshll.u32 %s342_s23, 4  ;;  %s339_s16 = scalar_lea.sflag [#allocation4], %s338_s13  ;;  %s2131_s25 = int_to_ptr.vmem [resolvable:$true] %s349_s25 }
  0x17   : > { %s1883_s14 = scalar_lea.hbm %s2123_s18, 128  ;;  %p1885_p3 = pneg %p2127_p13 }
  0x18   : > { %p1884_p2 = scmp.ne.s32.totalorder %s2123_s18, %s1883_s14  ;;  %s1888_s17 = scalar_lea.hbm %s2566_s0, 256 }
  0x19   : > { %p1889_p5 = scmp.lt.u32.totalorder %s2123_s18, %s2566_s0  ;;  %p1890_p8 = scmp.lt.u32.totalorder %s1888_s17, %s1883_s14 }
  0x1a   : > { %p1886_p4 = pnand %p1885_p3, %p1884_p2  ;;  %p1892_p9 = scmp.lt.u32.totalorder %s1883_s14, %s2123_s18 }
  0x1b   : > { %p1891_p10 = por %p1890_p8, %p1889_p5 }
  0x1c   : > { %p1887_p7 = pneg %p1886_p4 }
  0x1d   : > { %p1893_p0 = por %p1892_p9, %p1891_p10 }
  0x1f   : > { %p1894_p1 = pnand %p1893_p0, %p1887_p7 }
  0x21   : > { %1897 = shalt.err (!%p1894_p1)
}
  0x22   : > { %s1898_s13 = scalar_lea.vmem %s2131_s25, 128  ;;  %s1981_s28 = smov [#allocation3]  }
  0x23   : > { %p1899_p2 = scmp.ne.s32.totalorder %s2131_s25, %s1898_s13  ;;  %s1903_s15 = sshll.u32 %s1981_s28, 4  ;;  %s1904_s15 = int_to_ptr.vmem [resolvable:$false] %s1903_s15 }
  0x24   : > { %s1905_s27 = scalar_lea.vmem %s1904_s15, 256  ;;  %p1906_p11 = scmp.lt.s32.totalorder %s2131_s25, %s1904_s15 }
  0x25   : > { %p1901_p4 = pnand %p1899_p2, %p1885_p3  ;;  %p1907_p5 = scmp.lt.s32.totalorder %s1905_s27, %s1898_s13 }
  0x27   : > { %p1902_p12 = pneg %p1901_p4  ;;  %p1908_p8 = por %p1907_p5, %p1906_p11 }
  0x29   : > { %p1909_p9 = pnand %p1908_p8, %p1902_p12 }
  0x2b   : > { %1912 = shalt.err (!%p1909_p9)
}
  0x2c   : > { %1760 = dma.hbm_to_vmem [thread:$0]  (!%p2127_p13), %s2123_s18, 128, %s2131_s25, %s339_s16  }
  0x2d   : > { %p2585_p0 = scmp.lt.s32.totalorder %s1979_s22, 3  ;;  %p2586_p1 = scmp.ge.s32.totalorder %s1979_s22, 1 }
  0x2f   : > { %p355_p3 = pnand %p2586_p1, %p2585_p0 }
  0x30   : > { %s2165_s14 = sand.u32 (!%p355_p3), 1, %s1971_s20  }
  0x31   : > { %358 = sbr.rel (%p355_p3) target bundleno = 2710 (0xa96), region = 64  ;;  %s1664_s17 = sshll.u32 (!%p355_p3), %s2165_s14, 3 }
  0x32   : > { %s361_s23 = scalar_lea.sflag (!%p355_p3), [#allocation4], %s2165_s14  ;;  %s2171_s26 = scalar_lea.vmem (!%p355_p3), [#allocation3], %s1664_s17 }
  0x38   : > { %1958 = dma.done.wait (%p2103_p6), %s361_s23, 128  }
  0x39   : > { %1960 = vsyncadd (%p2103_p6), %s361_s23, 4294967168  ;;  %v1982_v0 = vmov 0.0   ;;  %vm1983_vm0 = vmmov 0   ;;  %v1815_v1 = vld [vmem:[%s2568_s2] sm:$0xff]   ;;  %v1816_v2 = vld [vmem:[%s2568_s2 + $0x8] sm:$0xff]   ;;  %vm422_vm1 = vcmask 261120   ;;  %v481_v14 = vlaneseq }
  0x3a   : > { %1709 = vmatprep.subr.bf16.mxu0 %v1982_v0  ;;  %1713 = vmatprep.mubr.msk.bf16.mxu0 %vm1983_vm0, %v1982_v0  ;;  %v404_v3 = vld [vmem:[%s2171_s26] sm:$0xff]  ;;  %s1984_s13 = smov 104   ;;  %s1985_s28 = smov 120   ;;  %v1988_v12 = vmov 1983009808   ;;  %vm544_vm2 = vcmask 60416  }
  0x3b   : > { %1733 = vmatprep.subr.bf16.mxu1 %v1982_v0  ;;  %1749 = vmatprep.mubr.msk.bf16.mxu1 %vm1983_vm0, %v1982_v0  ;;  %v405_v4 = vpack.c.bf16 %v404_v3, %v404_v3  ;;  %s1986_s15 = smov 96   ;;  %s1987_s27 = smov 112   ;;  %v479_v13 = vunpack.c.l.s4 %v1988_v12  ;;  %v2211_v16 = vshrl.u32 %v481_v14, 7  ;;  %v1989_v19 = vmov 1934713408  }
  0x3c   : > { %1710 = vmatpush3.bf16.msra.mxu0 %v1815_v1  ;;  %v511_v20 = vunpack.c.l.s4 %v1989_v19  ;;  %vm724_vm3 = vcmask 1041409   ;;  %vm726_vm4 = vcmask 1042434   ;;  %vm728_vm5 = vcmask 1043459   ;;  %s1992_s25 = smov 64   ;;  %s1995_s23 = smov 24  }
  0x3d   : > { %1711 = vmatprep.subr.bf16.mxu0 %v1982_v0  ;;  %v480_v15 = vunpack.c.0.s8 %v479_v13  ;;  %vm730_vm6 = vcmask 1044484   ;;  %vm732_vm7 = vcmask 1045509   ;;  %vm734_vm8 = vcmask 1046534   ;;  %s1373_s29 = sld [smem:[#allocation2]]  ;;  %s402_s18 = scalar_lea.vmem [#allocation6], %s1664_s17 }
  0x3e   : > { %v512_v24 = vunpack.c.0.s8 %v511_v20  ;;  %vm736_vm9 = vcmask 1047559   ;;  %vm953_vm11 = vcmask 64512   ;;  %p2587_p11 = scmp.ne.s32.totalorder %s2582_s30, 0 }
  0x3f   : > { %v2214_v21 = vsub.s32 %v480_v15, %v2211_v16 }
  0x40   : > { %1712 = vmatpush3.bf16.msra.mxu0 %v1816_v2  ;;  %v2223_v35 = vsub.s32 %v512_v24, %v2211_v16 }
  0x41   : > { %1717 = vmatprep.subr.bf16.mxu0 %v1982_v0 }
  0x43   : > { %1714 = vmatmul.mubr.msk.bf16.vlgmr.msra.gmra.mrb[0].mxu0 %vm422_vm1, %v405_v4 }
  0x44   : > { %1721 = vmatprep.mubr.msk.bf16.mxu0 %vm1983_vm0, %v1982_v0 }
 0x116   : > { %v2195_v5 = vpop.f32.mrb[0].mxu0 }
 0x117   : > { %473 = vrot.lane.b32.xlu1 %v2195_v5, %s1984_s13  ;;  %467 = vrot.lane.b32.xlu0 %v2195_v5, %s1985_s28  ;;  %v1715_v6 = vpop.f32.mrb[1].mxu0  ;;  %s1575_s13 = scalar_lea.sflag [#allocation5], %s2165_s14 }
 0x118   : > { %v463_v7 = vpop.f32.mrb[2].mxu0 }
 0x119   : > { %v1716_v8 = vpop.f32.mrb[3].mxu0 }
 0x11b   : > { %577 = vrot.lane.b32.xlu1 %v2195_v5, %s1986_s15  ;;  %470 = vrot.lane.b32.xlu0 %v2195_v5, %s1987_s27  ;;  %s1994_s27 = smov 8  }
 0x189   : > { %v2201_v9 = vpop.permute.xlu0 %467  ;;  %v2204_v10 = vpop.permute.xlu1 %473 }
 0x18a   : > { %579 = vrot.lane.b32.xlu0 %v2201_v9, %s1986_s15  ;;  %v492_v38 = vcombine.low %v2201_v9, %v2204_v10  ;;  %v493_v55 = vcombine.high %v2201_v9, %v2204_v10 }
 0x18c   : > { %v500_v48 = vrot.slane %v492_v38, %v2214_v21  ;;  %v507_v62 = vrot.slane %v493_v55, %v2214_v21 }
 0x18d   : > { %v2206_v11 = vpop.permute.xlu0 %470  ;;  %v578_v17 = vpop.permute.xlu1 %577 }
 0x18e   : > { %583 = vrot.lane.b32.xlu0 %v2204_v10, %s1986_s15  ;;  %581 = vrot.lane.b32.xlu1 %v2206_v11, %s1986_s15  ;;  %v476_v33 = vcombine.low %v2195_v5, %v2206_v11  ;;  %v477_v49 = vcombine.high %v2195_v5, %v2206_v11  ;;  %s1993_s15 = smov 16  }
 0x190   : > { %v484_v41 = vrot.slane %v476_v33, %v2214_v21  ;;  %v491_v56 = vrot.slane %v477_v49, %v2214_v21 }
 0x192   : > { %v508_v50 = vcombine.low %v484_v41, %v500_v48  ;;  %v509_v57 = vcombine.high %v484_v41, %v500_v48  ;;  %v524_v63 = vcombine.low %v491_v56, %v507_v62  ;;  %v525_v6 = vcombine.high %v491_v56, %v507_v62 }
 0x194   : > { %v516_v61 = vrot.slane %v508_v50, %v2223_v35  ;;  %v523_v4 = vrot.slane %v509_v57, %v2223_v35  ;;  %v532_v13 = vrot.slane %v524_v63, %v2223_v35  ;;  %v539_v19 = vrot.slane %v525_v6, %v2223_v35 }
 0x196   : > { %v540_v3 = vcombine.high %v516_v61, %v1982_v0  ;;  %v545_v8 = vsel %vm544_vm2, %v516_v61, 0.0  ;;  %v541_v12 = vcombine.high %v523_v4, %v1982_v0 }
 0x198   : > { %v548_v7 = vsel %vm544_vm2, %v540_v3, 0.0  ;;  %v554_v15 = vsel %vm544_vm2, %v541_v12, 0.0 }
 0x1fc   : > { %v580_v18 = vpop.permute.xlu0 %579 }
 0x200   : > { %v582_v22 = vpop.permute.xlu1 %581  ;;  %v584_v23 = vpop.permute.xlu0 %583 }
 0x201   : > { %v589_v25 = vcombine.low %v578_v17, %v582_v22  ;;  %v590_v26 = vcombine.high %v578_v17, %v582_v22  ;;  %v605_v27 = vcombine.low %v580_v18, %v584_v23  ;;  %v606_v28 = vcombine.high %v580_v18, %v584_v23 }
 0x202   : > { %v551_v17 = vsel %vm544_vm2, %v523_v4, 0.0  ;;  %v542_v18 = vcombine.high %v532_v13, %v1982_v0  ;;  %v557_v22 = vsel %vm544_vm2, %v532_v13, 0.0  ;;  %v543_v23 = vcombine.high %v539_v19, %v1982_v0 }
 0x203   : > { %v597_v29 = vrot.slane %v589_v25, %v2214_v21  ;;  %v604_v30 = vrot.slane %v590_v26, %v2214_v21  ;;  %v613_v31 = vrot.slane %v605_v27, %v2214_v21  ;;  %v620_v32 = vrot.slane %v606_v28, %v2214_v21 }
 0x204   : > { %v560_v20 = vsel %vm544_vm2, %v542_v18, 0.0  ;;  %v566_v24 = vsel %vm544_vm2, %v543_v23, 0.0  ;;  %v563_v25 = vsel %vm544_vm2, %v539_v19, 0.0  ;;  %v2268_v26 = vand.u32 127, %v481_v14 }
 0x205   : > { %v637_v34 = vcombine.low %v604_v30, %v620_v32  ;;  %v622_v36 = vcombine.high %v597_v29, %v613_v31  ;;  %v621_v37 = vcombine.low %v597_v29, %v613_v31  ;;  %v638_v42 = vcombine.high %v604_v30, %v620_v32 }
 0x206   : > { %v694_v29 = vsub.s32 %v2268_v26, %v2211_v16  ;;  %vm951_vm10 = vcmp.eq.s32.totalorder %v2211_v16, %v2268_v26 }
 0x207   : > { %v636_v39 = vrot.slane %v622_v36, %v2223_v35  ;;  %v629_v40 = vrot.slane %v621_v37, %v2223_v35  ;;  %v645_v43 = vrot.slane %v637_v34, %v2223_v35  ;;  %v652_v54 = vrot.slane %v638_v42, %v2223_v35 }
 0x209   : > { %v663_v44 = vsel %vm544_vm2, %v636_v39, 0.0  ;;  %v657_v45 = vsel %vm544_vm2, %v629_v40, 0.0  ;;  %v654_v46 = vcombine.high %v636_v39, %v1982_v0  ;;  %v653_v47 = vcombine.high %v629_v40, %v1982_v0 }
 0x20a   : > { %664 = vadd.xlane.f32.xlu0 %v663_v44  ;;  %658 = vadd.xlane.f32.xlu1 %v657_v45  ;;  %v655_v53 = vcombine.high %v645_v43, %v1982_v0  ;;  %v669_v59 = vsel %vm544_vm2, %v645_v43, 0.0  ;;  %v656_v60 = vcombine.high %v652_v54, %v1982_v0  ;;  %v675_v2 = vsel %vm544_vm2, %v652_v54, 0.0 }
 0x20b   : > { %v666_v51 = vsel %vm544_vm2, %v654_v46, 0.0  ;;  %v660_v52 = vsel %vm544_vm2, %v653_v47, 0.0 }
 0x20c   : > { %v672_v58 = vsel %vm544_vm2, %v655_v53, 0.0  ;;  %v678_v1 = vsel %vm544_vm2, %v656_v60, 0.0  ;;  %v2304_v60 = vsub.s32 0, %v2211_v16 }
 0x20e   : > { %667 = vadd.xlane.f32.xlu1 %v666_v51  ;;  %661 = vadd.xlane.f32.xlu0 %v660_v52  ;;  %v1990_v52 = vmov 1966171168  }
 0x20f   : > { %v782_v53 = vunpack.c.l.s4 %v1990_v52 }
 0x211   : > { %v783_v54 = vunpack.c.0.s8 %v782_v53 }
 0x212   : > { %673 = vadd.xlane.f32.xlu1 %v672_v58  ;;  %670 = vadd.xlane.f32.xlu0 %v669_v59  ;;  %v2300_v58 = vld [vmem:[%s2567_s1] sm:$0xff] }
 0x213   : > { %v786_v56 = vsub.s32 %v783_v54, %v2211_v16  ;;  %v780_v19 = vcombine.high %v2300_v58, %v2300_v58 }
 0x215   : > { %v787_v59 = vrot.slane %v2300_v58, %v786_v56 }
 0x216   : > { %679 = vadd.xlane.f32.xlu1 %v678_v1  ;;  %676 = vadd.xlane.f32.xlu0 %v675_v2 }
 0x217   : > { %v795_v61 = vcombine.high %v787_v59, %v787_v59  ;;  %v803_v1 = vrot.slane %v787_v59, %v786_v56 }
 0x219   : > { %v832_v4 = vrot.slane %v803_v1, %v2304_v60  ;;  %v817_v6 = vrot.slane %v795_v61, %v786_v56 }
 0x21a   : > { %549 = vadd.xlane.f32.xlu1 %v548_v7  ;;  %546 = vadd.xlane.f32.xlu0 %v545_v8 }
 0x21b   : > { %v836_v13 = vrot.slane %v817_v6, %v2304_v60 }
 0x21e   : > { %555 = vadd.xlane.f32.xlu1 %v554_v15  ;;  %552 = vadd.xlane.f32.xlu0 %v551_v17  ;;  %v825_v15 = vcombine.high %v803_v1, %v803_v1 }
 0x222   : > { %561 = vadd.xlane.f32.xlu1 %v560_v20  ;;  %558 = vadd.xlane.f32.xlu0 %v557_v22  ;;  %v827_v22 = vcombine.high %v817_v6, %v817_v6 }
 0x226   : > { %567 = vadd.xlane.f32.xlu1 %v566_v24  ;;  %564 = vadd.xlane.f32.xlu0 %v563_v25 }
 0x297   : > { %v2270_v27 = vpop.xlane.xlu0 %664  ;;  %v2272_v28 = vpop.xlane.xlu1 %658 }
 0x298   : > { %v695_v32 = vrot.slane %v2272_v28, %v694_v29  ;;  %v703_v14 = vrot.slane %v2270_v27, %v694_v29 }
 0x29b   : > { %v2276_v30 = vpop.xlane.xlu1 %667  ;;  %v2278_v31 = vpop.xlane.xlu0 %661 }
 0x29c   : > { %v699_v33 = vrot.slane %v2278_v31, %v694_v29  ;;  %v707_v34 = vrot.slane %v2276_v30, %v694_v29 }
 0x29e   : > { %v725_v36 = vsel %vm724_vm3, %v699_v33, %v695_v32  ;;  %v794_v33 = vrot.slane %v780_v19, %v786_v56 }
 0x29f   : > { %v727_v37 = vsel %vm726_vm4, %v703_v14, %v725_v36  ;;  %v2284_v38 = vpop.xlane.xlu1 %673  ;;  %v2286_v39 = vpop.xlane.xlu0 %670 }
 0x2a0   : > { %v729_v40 = vsel %vm728_vm5, %v707_v34, %v727_v37  ;;  %v711_v41 = vrot.slane %v2286_v39, %v694_v29  ;;  %v715_v42 = vrot.slane %v2284_v38, %v694_v29  ;;  %v844_v37 = vrot.slane %v827_v22, %v2304_v60 }
 0x2a1   : > { %v952_v22 = vsel %vm951_vm10, %v2300_v58, 0.0 }
 0x2a2   : > { %v731_v43 = vsel %vm730_vm6, %v711_v41, %v729_v40  ;;  %v810_v41 = vrot.slane %v794_v33, %v786_v56  ;;  %vm1279_vm6 = vcmask 130048  }
 0x2a3   : > { %v2290_v44 = vpop.xlane.xlu1 %679  ;;  %v2292_v45 = vpop.xlane.xlu0 %676  ;;  %v733_v48 = vsel %vm732_vm7, %v715_v42, %v731_v43  ;;  %v796_v42 = vcombine.high %v794_v33, %v794_v33  ;;  %vm1281_vm7 = vcmask 195584  }
 0x2a4   : > { %v723_v46 = vrot.slane %v2290_v44, %v694_v29  ;;  %v719_v47 = vrot.slane %v2292_v45, %v694_v29  ;;  %v840_v29 = vrot.slane %v825_v15, %v2304_v60  ;;  %v826_v52 = vcombine.high %v810_v41, %v810_v41 }
 0x2a6   : > { %v735_v49 = vsel %vm734_vm8, %v719_v47, %v733_v48 }
 0x2a7   : > { %v737_v50 = vsel %vm736_vm9, %v723_v46, %v735_v49  ;;  %v547_v51 = vpop.xlane.xlu0 %546  ;;  %v550_v62 = vpop.xlane.xlu1 %549  ;;  %v848_v49 = vrot.slane %v810_v41, %v2304_v60 }
 0x2a8   : > { %739 = vxpose.xlu0.b32.start.end [1/1] (short) (narrow) %v737_v50, 8  ;;  %v2306_v2 = vmul.f32 0.17677669, %v550_v62  ;;  %v2308_v3 = vmul.f32 0.17677669, %v547_v51  ;;  %v824_v51 = vrot.slane %v796_v42, %v786_v56  ;;  %v856_v56 = vrot.slane %v826_v52, %v2304_v60 }
 0x2aa   : > { %v828_v62 = vcombine.high %v824_v51, %v824_v51 }
 0x2ab   : > { %v553_v55 = vpop.xlane.xlu0 %552  ;;  %v556_v20 = vpop.xlane.xlu1 %555 }
 0x2ac   : > { %v2314_v17 = vmul.f32 0.17677669, %v553_v55  ;;  %v2321_v32 = vmul.f32 0.17677669, %v556_v20 }
 0x2af   : > { %v559_v57 = vpop.xlane.xlu0 %558  ;;  %v562_v43 = vpop.xlane.xlu1 %561 }
 0x2b0   : > { %v2326_v40 = vmul.f32 0.17677669, %v559_v57  ;;  %v2331_v50 = vmul.f32 0.17677669, %v562_v43  ;;  %v852_v57 = vrot.slane %v824_v51, %v2304_v60 }
 0x2b3   : > { %v565_v63 = vpop.xlane.xlu0 %564  ;;  %v568_v61 = vpop.xlane.xlu1 %567 }
 0x2b4   : > { %v2336_v59 = vmul.f32 0.17677669, %v565_v63  ;;  %v860_v63 = vrot.slane %v828_v62, %v2304_v60 }
 0x328   : > { %v755_v7 = vpop.trf.xlu0 }
 0x329   : > { %v771_v8 = vmul.f32 %v755_v7, %v2308_v3  ;;  %v772_v12 = vmul.f32 %v755_v7, %v2306_v2  ;;  %v773_v25 = vmul.f32 %v755_v7, %v2314_v17  ;;  %v774_v36 = vmul.f32 %v755_v7, %v2321_v32 }
 0x32a   : > { %v775_v48 = vmul.f32 %v755_v7, %v2326_v40  ;;  %v776_v55 = vmul.f32 %v755_v7, %v2331_v50  ;;  %v777_v6 = vmul.f32 %v755_v7, %v2336_v59 }
 0x32b   : > { %v869_v18 = vadd.f32 %v832_v4, %v771_v8  ;;  %v870_v24 = vadd.f32 %v836_v13, %v772_v12  ;;  %v871_v34 = vadd.f32 %v840_v29, %v773_v25  ;;  %v872_v47 = vadd.f32 %v844_v37, %v774_v36 }
 0x32c   : > { %v873_v54 = vadd.f32 %v848_v49, %v775_v48  ;;  %v874_v4 = vadd.f32 %v852_v57, %v776_v55  ;;  %v2341_v8 = vmul.f32 0.17677669, %v568_v61  ;;  %v875_v13 = vadd.f32 %v856_v56, %v777_v6 }
 0x32d   : > { %v877_v23 = vsel %vm544_vm2, %v869_v18, -inf  ;;  %v880_v14 = vsel %vm544_vm2, %v870_v24, -inf  ;;  %v883_v46 = vsel %vm544_vm2, %v871_v34, -inf  ;;  %v886_v53 = vsel %vm544_vm2, %v872_v47, -inf }
 0x32e   : > { %878 = vmax.xlane.f32.xlu1 %v877_v23  ;;  %v889_v1 = vsel %vm544_vm2, %v873_v54, -inf  ;;  %v892_v12 = vsel %vm544_vm2, %v874_v4, -inf  ;;  %v778_v15 = vmul.f32 %v755_v7, %v2341_v8  ;;  %v895_v19 = vsel %vm544_vm2, %v875_v13, -inf }
 0x32f   : > { %v954_v7 = vsel %vm953_vm11, %v952_v22, 0.0  ;;  %v958_v56 = vmul.f32 %v2278_v31, %v2306_v2  ;;  %v976_v22 = vsub.s32 2, %v2211_v16  ;;  %v980_v31 = vsub.s32 3, %v2211_v16 }
 0x330   : > { %v2347_v20 = vadd.f32 %v860_v63, %v778_v15  ;;  %v988_v2 = vsub.s32 5, %v2211_v16 }
 0x332   : > { %881 = vmax.xlane.f32.xlu1 %v880_v14  ;;  %v898_v23 = vsel %vm544_vm2, %v2347_v20, -inf }
 0x336   : > { %884 = vmax.xlane.f32.xlu1 %v883_v46 }
 0x33a   : > { %887 = vmax.xlane.f32.xlu1 %v886_v53 }
 0x33e   : > { %890 = vmax.xlane.f32.xlu1 %v889_v1 }
 0x342   : > { %893 = vmax.xlane.f32.xlu1 %v892_v12  ;;  %v957_v12 = vmul.f32 %v2272_v28, %v2308_v3  ;;  %v984_v28 = vsub.s32 4, %v2211_v16 }
 0x346   : > { %896 = vmax.xlane.f32.xlu1 %v895_v19  ;;  %v972_v19 = vsub.s32 1, %v2211_v16 }
 0x34a   : > { %899 = vmax.xlane.f32.xlu1 %v898_v23 }
 0x34e   : > { %955 = vadd.xlane.f32.xlu1 %v954_v7  ;;  %v996_v7 = vsub.s32 7, %v2211_v16 }
 0x3bb   : > { %v2355_v25 = vpop.xlane.xlu1 %878 }
 0x3bc   : > { %v901_v29 = vsub.f32 %v869_v18, %v2355_v25 }
 0x3be   : > { %v909_v33 = vmul.f32 1.442695, %v901_v29  ;;  %v961_v29 = vmul.f32 %v2286_v39, %v2326_v40 }
 0x3bf   : > { %v2358_v14 = vpop.xlane.xlu1 %881 }
 0x3c0   : > { %1830 = vpow2.f32 %v909_v33  ;;  %v902_v26 = vsub.f32 %v870_v24, %v2358_v14  ;;  %v964_v33 = vmul.f32 %v2290_v44, %v2341_v8 }
 0x3c2   : > { %v911_v36 = vmul.f32 1.442695, %v902_v26  ;;  %v963_v26 = vmul.f32 %v2292_v45, %v2336_v59 }
 0x3c3   : > { %v2361_v58 = vpop.xlane.xlu1 %884 }
 0x3c4   : > { %1832 = vpow2.f32 %v911_v36  ;;  %v903_v37 = vsub.f32 %v871_v34, %v2361_v58 }
 0x3c6   : > { %v913_v41 = vmul.f32 1.442695, %v903_v37 }
 0x3c7   : > { %v2364_v42 = vpop.xlane.xlu1 %887 }
 0x3c8   : > { %1834 = vpow2.f32 %v913_v41  ;;  %v904_v43 = vsub.f32 %v872_v47, %v2364_v42 }
 0x3ca   : > { %v1831_v46 = vpop.eup %1830  ;;  %v915_v18 = vmul.f32 1.442695, %v904_v43 }
 0x3cb   : > { %v2367_v48 = vpop.xlane.xlu1 %890  ;;  %v925_v49 = vsel %vm544_vm2, %v1831_v46, 0.0 }
 0x3cc   : > { %1836 = vpow2.f32 %v915_v18  ;;  %v905_v24 = vsub.f32 %v873_v54, %v2367_v48  ;;  %926 = vadd.xlane.f32.xlu1 %v925_v49 }
 0x3ce   : > { %v1833_v51 = vpop.eup %1832  ;;  %v917_v52 = vmul.f32 1.442695, %v905_v24 }
 0x3cf   : > { %v2371_v53 = vpop.xlane.xlu1 %893  ;;  %v928_v34 = vsel %vm544_vm2, %v1833_v51, 0.0 }
 0x3d0   : > { %1838 = vpow2.f32 %v917_v52  ;;  %v906_v55 = vsub.f32 %v874_v4, %v2371_v53  ;;  %929 = vadd.xlane.f32.xlu1 %v928_v34  ;;  %v960_v4 = vmul.f32 %v2276_v30, %v2321_v32  ;;  %v992_v30 = vsub.s32 6, %v2211_v16 }
 0x3d1   : > { %v959_v32 = vmul.f32 %v2270_v27, %v2314_v17 }
 0x3d2   : > { %v1835_v47 = vpop.eup %1834  ;;  %v919_v57 = vmul.f32 1.442695, %v906_v55 }
 0x3d3   : > { %v2375_v61 = vpop.xlane.xlu1 %896  ;;  %v931_v62 = vsel %vm544_vm2, %v1835_v47, 0.0 }
 0x3d4   : > { %1840 = vpow2.f32 %v919_v57  ;;  %v907_v54 = vsub.f32 %v875_v13, %v2375_v61  ;;  %932 = vadd.xlane.f32.xlu0 %v931_v62 }
 0x3d6   : > { %v1837_v1 = vpop.eup %1836  ;;  %v921_v6 = vmul.f32 1.442695, %v907_v54 }
 0x3d7   : > { %v2385_v15 = vpop.xlane.xlu1 %899  ;;  %v934_v63 = vsel %vm544_vm2, %v1837_v1, 0.0 }
 0x3d8   : > { %1842 = vpow2.f32 %v921_v6  ;;  %v908_v13 = vsub.f32 %v2347_v20, %v2385_v15  ;;  %935 = vadd.xlane.f32.xlu1 %v934_v63  ;;  %v962_v20 = vmul.f32 %v2284_v38, %v2331_v50  ;;  %v1991_v6 = vmov 0  }
 0x3d9   : > { %1813 = vset.pattern.permute.xlu1 %v1991_v6  ;;  %1814 = vset.pattern.permute.xlu0 %v1991_v6 }
 0x3da   : > { %v1839_v3 = vpop.eup %1838  ;;  %v923_v23 = vmul.f32 1.442695, %v908_v13 }
 0x3db   : > { %v956_v36 = vpop.xlane.xlu1 %955  ;;  %v937_v37 = vsel %vm544_vm2, %v1839_v3, 0.0 }
 0x3dc   : > { %1844 = vpow2.f32 %v923_v23  ;;  %938 = vadd.xlane.f32.xlu1 %v937_v37  ;;  %v969_v27 = vrot.slane %v956_v36, %v2304_v60  ;;  %v973_v38 = vrot.slane %v956_v36, %v972_v19  ;;  %v977_v17 = vrot.slane %v956_v36, %v976_v22 }
 0x3dd   : > { %v981_v50 = vrot.slane %v956_v36, %v980_v31  ;;  %v985_v16 = vrot.slane %v956_v36, %v984_v28  ;;  %v989_v41 = vrot.slane %v956_v36, %v988_v2  ;;  %v993_v43 = vrot.slane %v956_v36, %v992_v30 }
 0x3de   : > { %v1841_v39 = vpop.eup %1840  ;;  %v1006_v40 = vadd.f32 %v969_v27, %v957_v12  ;;  %v1007_v46 = vadd.f32 %v973_v38, %v958_v56  ;;  %v1008_v44 = vadd.f32 %v977_v17, %v959_v32  ;;  %v997_v8 = vrot.slane %v956_v36, %v996_v7 }
 0x3df   : > { %v940_v45 = vsel %vm544_vm2, %v1841_v39, 0.0  ;;  %v1009_v59 = vadd.f32 %v981_v50, %v960_v4  ;;  %v1010_v18 = vadd.f32 %v985_v16, %v961_v29  ;;  %v1011_v49 = vadd.f32 %v989_v41, %v962_v20 }
 0x3e0   : > { %941 = vadd.xlane.f32.xlu1 %v940_v45  ;;  %v1014_v24 = vsub.f32 %v1006_v40, %v2355_v25  ;;  %v1015_v60 = vsub.f32 %v1007_v46, %v2358_v14  ;;  %v1016_v51 = vsub.f32 %v1008_v44, %v2361_v58  ;;  %v1012_v52 = vadd.f32 %v993_v43, %v963_v26 }
 0x3e1   : > { %v1017_v34 = vsub.f32 %v1009_v59, %v2364_v42  ;;  %v1018_v55 = vsub.f32 %v1010_v18, %v2367_v48  ;;  %v1019_v47 = vsub.f32 %v1011_v49, %v2371_v53  ;;  %v2416_v57 = vadd.f32 %v997_v8, %v964_v33 }
 0x3e2   : > { %v1843_v62 = vpop.eup %1842  ;;  %v1020_v54 = vsub.f32 %v1012_v52, %v2375_v61  ;;  %v1022_v42 = vmul.f32 1.442695, %v1014_v24  ;;  %v1024_v53 = vmul.f32 1.442695, %v1015_v60  ;;  %v1026_v56 = vmul.f32 1.442695, %v1016_v51 }
 0x3e3   : > { %v943_v1 = vsel %vm544_vm2, %v1843_v62, 0.0  ;;  %v1021_v25 = vsub.f32 %v2416_v57, %v2385_v15  ;;  %v1028_v4 = vmul.f32 1.442695, %v1017_v34  ;;  %v1032_v28 = vmul.f32 1.442695, %v1019_v47  ;;  %v1818_v51 = vld [vmem:[%s2569_s3] sm:$0xff]  }
 0x3e4   : > { %944 = vadd.xlane.f32.xlu1 %v943_v1  ;;  %1846 = vpow2.f32 %v1022_v42  ;;  %v1034_v23 = vmul.f32 1.442695, %v1020_v54  ;;  %1718 = vmatpush3.bf16.msra.mxu0 %v1818_v51 }
 0x3e5   : > { %v1036_v37 = vmul.f32 1.442695, %v1021_v25  ;;  %1719 = vmatprep.subr.bf16.mxu0 %v1982_v0 }
 0x3e6   : > { %v1845_v14 = vpop.eup %1844 }
 0x3e7   : > { %v946_v58 = vsel %vm544_vm2, %v1845_v14, 0.0 }
 0x3e8   : > { %947 = vadd.xlane.f32.xlu1 %v946_v58 }
 0x3ea   : > { %1076 = vrot.lane.b32.xlu0 %v2204_v10, %s1992_s25 }
 0x3ee   : > { %v1847_v10 = vpop.eup %1846 }
 0x3f9   : > { %1070 = vrot.lane.b32.xlu1 %v2195_v5, %s1992_s25 }
 0x3fd   : > { %1072 = vrot.lane.b32.xlu1 %v2201_v9, %s1992_s25  ;;  %v1030_v9 = vmul.f32 1.442695, %v1018_v55 }
 0x401   : > { %1074 = vrot.lane.b32.xlu1 %v2206_v11, %s1992_s25  ;;  %s1588_s25 = sshll.u32 %s402_s18, 4  ;;  %s2523_s25 = int_to_ptr.vmem [resolvable:$true] %s1588_s25 }
 0x402   : > { %s1913_s28 = scalar_lea.vmem %s2523_s25, 128 }
 0x403   : > { %p1914_p6 = scmp.ne.s32.totalorder %s2523_s25, %s1913_s28 }
 0x405   : > { %p1915_p12 = pnand %p1914_p6, %p2587_p11 }
 0x407   : > { %p1916_p13 = pneg %p1915_p12 }
 0x459   : > { %v927_v48 = vpop.xlane.xlu1 %926 }
 0x45a   : > { %1848 = vrcp.f32 %v927_v48 }
 0x45b   : > { %1850 = vpow2.f32 %v1024_v53 }
 0x45d   : > { %v930_v61 = vpop.xlane.xlu1 %929 }
 0x45e   : > { %1852 = vrcp.f32 %v930_v61 }
 0x45f   : > { %1854 = vpow2.f32 %v1026_v56 }
 0x461   : > { %v933_v12 = vpop.xlane.xlu0 %932 }
 0x462   : > { %1856 = vrcp.f32 %v933_v12 }
 0x463   : > { %1858 = vpow2.f32 %v1028_v4 }
 0x464   : > { %v1849_v15 = vpop.eup %1848 }
 0x465   : > { %v936_v5 = vpop.xlane.xlu1 %935  ;;  %v1046_v63 = vmul.f32 %v1849_v15, %v1847_v10  ;;  %v1851_v11 = vpop.eup %1850 }
 0x466   : > { %1860 = vrcp.f32 %v936_v5  ;;  %v1077_v62 = vpop.permute.xlu0 %1076 }
 0x467   : > { %vm1054_vm12 = vcmp.ne.f32.partialorder %v1046_v63, %v1046_v63  ;;  %1862 = vpow2.f32 %v1030_v9 }
 0x468   : > { %v1853_v13 = vpop.eup %1852  ;;  %v1062_v19 = vsel %vm1054_vm12, 0.0, %v1046_v63 }
 0x469   : > { %1152 = vperm.xlu1 %1813, %v1062_v19   ;;  %v939_v22 = vpop.xlane.xlu1 %938  ;;  %v1047_v31 = vmul.f32 %v1853_v13, %v1851_v11  ;;  %v1855_v2 = vpop.eup %1854 }
 0x46a   : > { %1864 = vrcp.f32 %v939_v22 }
 0x46b   : > { %vm1055_vm13 = vcmp.ne.f32.partialorder %v1047_v31, %v1047_v31  ;;  %1866 = vpow2.f32 %v1032_v28 }
 0x46c   : > { %v1857_v30 = vpop.eup %1856  ;;  %v1063_v3 = vsel %vm1055_vm13, 0.0, %v1047_v31 }
 0x46d   : > { %1157 = vperm.xlu1 %1813, %v1063_v3   ;;  %v942_v32 = vpop.xlane.xlu1 %941  ;;  %v1048_v20 = vmul.f32 %v1857_v30, %v1855_v2  ;;  %v1859_v7 = vpop.eup %1858 }
 0x46e   : > { %1868 = vrcp.f32 %v942_v32 }
 0x46f   : > { %vm1056_vm14 = vcmp.ne.f32.partialorder %v1048_v20, %v1048_v20  ;;  %1870 = vpow2.f32 %v1034_v23 }
 0x470   : > { %v1861_v29 = vpop.eup %1860  ;;  %v1064_v33 = vsel %vm1056_vm14, 0.0, %v1048_v20 }
 0x471   : > { %1162 = vperm.xlu1 %1813, %v1064_v33   ;;  %v945_v26 = vpop.xlane.xlu1 %944  ;;  %v1049_v36 = vmul.f32 %v1861_v29, %v1859_v7  ;;  %v1863_v27 = vpop.eup %1862 }
 0x472   : > { %1872 = vrcp.f32 %v945_v26 }
 0x473   : > { %vm1057_vm15 = vcmp.ne.f32.partialorder %v1049_v36, %v1049_v36  ;;  %1874 = vpow2.f32 %v1036_v37 }
 0x474   : > { %v1865_v38 = vpop.eup %1864  ;;  %v1065_v17 = vsel %vm1057_vm15, 0.0, %v1049_v36  ;;  %v1819_v36 = vld [vmem:[%s2569_s3 + $0x8] sm:$0xff]  }
 0x475   : > { %1167 = vperm.xlu1 %1813, %v1065_v17   ;;  %v948_v50 = vpop.xlane.xlu1 %947  ;;  %v1050_v16 = vmul.f32 %v1865_v38, %v1863_v27  ;;  %v1867_v41 = vpop.eup %1866  ;;  %1720 = vmatpush3.bf16.msra.mxu0 %v1819_v36 }
 0x476   : > { %1876 = vrcp.f32 %v948_v50  ;;  %1725 = vmatprep.subr.bf16.mxu0 %v1982_v0 }
 0x477   : > { %vm1058_vm2 = vcmp.ne.f32.partialorder %v1050_v16, %v1050_v16 }
 0x478   : > { %v1869_v43 = vpop.eup %1868  ;;  %v1066_v39 = vsel %vm1058_vm2, 0.0, %v1050_v16 }
 0x479   : > { %1172 = vperm.xlu1 %1813, %v1066_v39   ;;  %v1051_v40 = vmul.f32 %v1869_v43, %v1867_v41  ;;  %v1871_v46 = vpop.eup %1870  ;;  %v1071_v52 = vpop.permute.xlu1 %1070 }
 0x47b   : > { %vm1059_vm3 = vcmp.ne.f32.partialorder %v1051_v40, %v1051_v40 }
 0x47c   : > { %v1873_v44 = vpop.eup %1872  ;;  %v1067_v8 = vsel %vm1059_vm3, 0.0, %v1051_v40 }
 0x47d   : > { %1177 = vperm.xlu1 %1813, %v1067_v8   ;;  %v1052_v45 = vmul.f32 %v1873_v44, %v1871_v46  ;;  %v1875_v59 = vpop.eup %1874  ;;  %v1073_v34 = vpop.permute.xlu1 %1072 }
 0x47e   : > { %v1098_v1 = vcombine.low %v1073_v34, %v1077_v62  ;;  %v1099_v53 = vcombine.high %v1073_v34, %v1077_v62 }
 0x47f   : > { %vm1060_vm4 = vcmp.ne.f32.partialorder %v1052_v45, %v1052_v45 }
 0x480   : > { %v1877_v18 = vpop.eup %1876  ;;  %v1068_v49 = vsel %vm1060_vm4, 0.0, %v1052_v45  ;;  %v1106_v58 = vrot.slane %v1098_v1, %v2214_v21  ;;  %v1113_v4 = vrot.slane %v1099_v53, %v2214_v21 }
 0x481   : > { %1182 = vperm.xlu0 %1814, %v1068_v49   ;;  %v1053_v24 = vmul.f32 %v1877_v18, %v1875_v59  ;;  %v1075_v55 = vpop.permute.xlu1 %1074 }
 0x482   : > { %v1082_v57 = vcombine.low %v1071_v52, %v1075_v55  ;;  %v1083_v6 = vcombine.high %v1071_v52, %v1075_v55 }
 0x483   : > { %vm1061_vm5 = vcmp.ne.f32.partialorder %v1053_v24, %v1053_v24 }
 0x484   : > { %v1069_v60 = vsel %vm1061_vm5, 0.0, %v1053_v24  ;;  %v1090_v25 = vrot.slane %v1082_v57, %v2214_v21  ;;  %v1097_v56 = vrot.slane %v1083_v6, %v2214_v21 }
 0x485   : > { %1187 = vperm.xlu1 %1813, %v1069_v60  }
 0x486   : > { %v1115_v42 = vcombine.high %v1090_v25, %v1106_v58  ;;  %v1114_v61 = vcombine.low %v1090_v25, %v1106_v58  ;;  %v1130_v63 = vcombine.low %v1097_v56, %v1113_v4  ;;  %v1131_v9 = vcombine.high %v1097_v56, %v1113_v4  ;;  %v1821_v4 = vld [vmem:[%s2572_s6 + $0x8] sm:$0xff]  }
 0x488   : > { %v1129_v12 = vrot.slane %v1115_v42, %v2223_v35  ;;  %v1122_v10 = vrot.slane %v1114_v61, %v2223_v35  ;;  %v1138_v31 = vrot.slane %v1130_v63, %v2223_v35  ;;  %v1145_v28 = vrot.slane %v1131_v9, %v2223_v35  ;;  %v1825_v63 = vld [vmem:[%s2575_s9 + $0x18] sm:$0xff]   ;;  %v1826_v9 = vld [vmem:[%s2575_s9 + $0x20] sm:$0xff]  }
 0x48a   : > { %v1147_v5 = vcombine.high %v1129_v12, %v1982_v0  ;;  %v1146_v11 = vcombine.high %v1122_v10, %v1982_v0  ;;  %v1148_v29 = vcombine.high %v1138_v31, %v1982_v0  ;;  %v1149_v33 = vcombine.high %v1145_v28, %v1982_v0 }
 0x4e8   : > { %v1153_v47 = vpop.permute.xlu1 %1152 }
 0x4e9   : > { %v1190_v3 = vmul.f32 %v1153_v47, %v1122_v10  ;;  %v1822_v10 = vld [vmem:[%s2575_s9] sm:$0xff]  }
 0x4ea   : > { %1734 = vmatpush3.bf16.msra.mxu1 %v1822_v10 }
 0x4eb   : > { %1735 = vmatprep.subr.bf16.mxu1 %v1982_v0 }
 0x4ec   : > { %v1158_v54 = vpop.permute.xlu1 %1157 }
 0x4ed   : > { %v1191_v19 = vmul.f32 %v1158_v54, %v1146_v11  ;;  %v1882_v54 = vld [vmem:[%s2171_s26] sm:$0xff] }
 0x4ee   : > { %v1827_v11 = vld [vmem:[%s2575_s9 + $0x28] sm:$0xff]  }
 0x4f0   : > { %v1163_v14 = vpop.permute.xlu1 %1162 }
 0x4f1   : > { %v1192_v22 = vmul.f32 %v1163_v14, %v1129_v12  ;;  %v1820_v12 = vld [vmem:[%s2572_s6] sm:$0xff]  }
 0x4f3   : > { %v1198_v23 = vcombine.low %v1190_v3, %v1192_v22 }
 0x4f4   : > { %v1168_v48 = vpop.permute.xlu1 %1167 }
 0x4f5   : > { %v1193_v13 = vmul.f32 %v1168_v48, %v1147_v5  ;;  %v1205_v50 = vrot.slane %v1198_v23, %v2214_v21  ;;  %v1824_v5 = vld [vmem:[%s2575_s9 + $0x10] sm:$0xff]  }
 0x4f6   : > { %v1828_v23 = vld [vmem:[%s2575_s9 + $0x30] sm:$0xff]  }
 0x4f7   : > { %v1206_v32 = vcombine.low %v1191_v19, %v1193_v13 }
 0x4f8   : > { %v1173_v15 = vpop.permute.xlu1 %1172 }
 0x4f9   : > { %v1194_v7 = vmul.f32 %v1173_v15, %v1138_v31  ;;  %v1213_v37 = vrot.slane %v1206_v32, %v2214_v21  ;;  %v1823_v15 = vld [vmem:[%s2575_s9 + $0x8] sm:$0xff]  }
 0x4fa   : > { %1736 = vmatpush3.bf16.msra.mxu1 %v1823_v15 }
 0x4fb   : > { %v1230_v41 = vcombine.low %v1205_v50, %v1213_v37  ;;  %v1231_v43 = vcombine.high %v1205_v50, %v1213_v37  ;;  %1737 = vmatprep.subr.bf16.mxu1 %v1982_v0 }
 0x4fc   : > { %v1178_v2 = vpop.permute.xlu1 %1177 }
 0x4fd   : > { %v1195_v27 = vmul.f32 %v1178_v2, %v1148_v29  ;;  %v1245_v8 = vrot.slane %v1231_v43, %v2223_v35  ;;  %v1238_v59 = vrot.slane %v1230_v41, %v2223_v35  ;;  %v1674_v29 = vld [vmem:[%s2573_s7] ss:$0 sm:$0xff] }
 0x4fe   : > { %1738 = vmatpush3.bf16.msra.mxu1 %v1824_v5 }
 0x4ff   : > { %1739 = vmatprep.subr.bf16.mxu1 %v1982_v0 }
 0x500   : > { %v1183_v30 = vpop.permute.xlu0 %1182 }
 0x501   : > { %v1196_v20 = vmul.f32 %v1183_v30, %v1145_v28  ;;  %v1672_v28 = vld [vmem:[%s2570_s4] ss:$0 sm:$0xff] }
 0x502   : > { %1740 = vmatpush3.bf16.msra.mxu1 %v1825_v63  ;;  %v1673_v30 = vld [vmem:[%s2571_s5] ss:$0 sm:$0xff] }
 0x503   : > { %v1214_v38 = vcombine.low %v1194_v7, %v1196_v20  ;;  %1741 = vmatprep.subr.bf16.mxu1 %v1982_v0  ;;  %v1829_v7 = vld [vmem:[%s2575_s9 + $0x38] sm:$0xff]  }
 0x504   : > { %v1188_v26 = vpop.permute.xlu1 %1187 }
 0x505   : > { %v1197_v17 = vmul.f32 %v1188_v26, %v1149_v33  ;;  %v1221_v39 = vrot.slane %v1214_v38, %v2214_v21  ;;  %v1442_v26 = vstv %s1373_s29 }
 0x506   : > { %1742 = vmatpush3.bf16.msra.mxu1 %v1826_v9 }
 0x507   : > { %v1222_v16 = vcombine.low %v1195_v27, %v1197_v17  ;;  %1743 = vmatprep.subr.bf16.mxu1 %v1982_v0 }
 0x509   : > { %v1229_v40 = vrot.slane %v1222_v16, %v2214_v21 }
 0x50a   : > { %1744 = vmatpush3.bf16.msra.mxu1 %v1827_v11 }
 0x50b   : > { %v1246_v46 = vcombine.low %v1221_v39, %v1229_v40  ;;  %v1247_v44 = vcombine.high %v1221_v39, %v1229_v40  ;;  %1745 = vmatprep.subr.bf16.mxu1 %v1982_v0 }
 0x50d   : > { %v1261_v45 = vrot.slane %v1247_v44, %v2223_v35  ;;  %v1254_v18 = vrot.slane %v1246_v46, %v2223_v35 }
 0x50e   : > { %1746 = vmatpush3.bf16.msra.mxu1 %v1828_v23 }
 0x50f   : > { %v1264_v49 = vcombine.low %v1245_v8, %v1261_v45  ;;  %v1263_v24 = vcombine.high %v1238_v59, %v1254_v18  ;;  %v1262_v60 = vcombine.low %v1238_v59, %v1254_v18  ;;  %v1265_v51 = vcombine.high %v1245_v8, %v1261_v45  ;;  %1747 = vmatprep.subr.bf16.mxu1 %v1982_v0 }
 0x511   : > { %1271 = vrot.lane.b32.xlu0 %v1264_v49, %s1993_s15  ;;  %1267 = vrot.lane.b32.xlu1 %v1263_v24, %s1994_s27 }
 0x512   : > { %1748 = vmatpush3.bf16.msra.mxu1 %v1829_v7 }
 0x515   : > { %1275 = vrot.lane.b32.xlu1 %v1265_v51, %s1995_s23  ;;  %s1688_s23 = sshll.u32 %s2081_s8, 7  ;;  %s1996_s8 = smov [#allocation6]  }
 0x516   : > { %s2521_s29 = scalar_lea.hbm %s2577_s11, %s1688_s23  ;;  %s1917_s17 = sshll.u32 %s1996_s8, 4  ;;  %s1918_s17 = int_to_ptr.vmem [resolvable:$false] %s1917_s17 }
 0x517   : > { %s1919_s15 = scalar_lea.vmem %s1918_s17, 256  ;;  %p1920_p7 = scmp.lt.s32.totalorder %s2523_s25, %s1918_s17 }
 0x518   : > { %p1921_p10 = scmp.lt.s32.totalorder %s1919_s15, %s1913_s28 }
 0x51a   : > { %p1922_p2 = por %p1921_p10, %p1920_p7 }
 0x51c   : > { %p1923_p4 = pnand %p1922_p2, %p1916_p13 }
 0x583   : > { %v1268_v21 = vpop.permute.xlu1 %1267  ;;  %v1272_v52 = vpop.permute.xlu0 %1271 }
 0x584   : > { %v1278_v34 = vsel %vm953_vm11, %v1262_v60, %v1268_v21 }
 0x585   : > { %v1280_v47 = vsel %vm1279_vm6, %v1278_v34, %v1272_v52 }
 0x587   : > { %v1276_v55 = vpop.permute.xlu1 %1275 }
 0x588   : > { %v1282_v35 = vsel %vm1281_vm7, %v1280_v47, %v1276_v55 }
 0x589   : > { %v1283_v57 = vpack.c.bf16 %v1282_v35, %v1282_v35 }
 0x58b   : > { %1722 = vmatmul.mubr.msk.bf16.vlgmr.msra.gmra.mrb[4].mxu0 %vm422_vm1, %v1283_v57 }
 0x58c   : > { %1729 = vmatprep.mubr.msk.bf16.mxu0 %vm1983_vm0, %v1982_v0  ;;  %1726 = vmatpush3.bf16.msra.mxu0 %v1820_v12 }
 0x58d   : > { %1727 = vmatprep.subr.bf16.mxu0 %v1982_v0  ;;  %v1678_v0 = vld [vmem:[%s2576_s10] ss:$0 sm:$0xff] }
 0x590   : > { %1728 = vmatpush3.bf16.msra.mxu0 %v1821_v4 }
 0x65e   : > { %v1339_v62 = vpop.f32.mrb[4].mxu0 }
 0x65f   : > { %v1340_v1 = vadd.f32 %v1882_v54, %v1339_v62  ;;  %v1723_v25 = vpop.f32.mrb[5].mxu0 }
 0x660   : > { %v1342_v14 = vpop.f32.mrb[6].mxu0 }
 0x661   : > { %v1724_v58 = vpop.f32.mrb[7].mxu0  ;;  %v1345_v6 = vsel %vm422_vm1, %v1340_v1, 0.0 }
 0x662   : > { %1346 = vadd.xlane.f32.xlu0 %v1345_v6 }
 0x6ef   : > { %v1347_v42 = vpop.xlane.xlu0 %1346 }
 0x6f0   : > { %v1349_v48 = vmul.f32 0.03125, %v1347_v42 }
 0x6f2   : > { %v1350_v53 = vsub.f32 %v1340_v1, %v1349_v48 }
 0x6f4   : > { %v1351_v61 = vmul.f32 %v1350_v53, %v1350_v53 }
 0x6f6   : > { %v1352_v56 = vsel %vm422_vm1, %v1351_v61, 0.0 }
 0x6f7   : > { %1353 = vadd.xlane.f32.xlu1 %v1352_v56 }
 0x784   : > { %v1354_v13 = vpop.xlane.xlu1 %1353 }
 0x785   : > { %v1355_v19 = vmul.f32 0.03125, %v1354_v13 }
 0x787   : > { %v1356_v22 = vadd.f32 1e-05, %v1355_v19 }
 0x789   : > { %1878 = vrsqrt.f32 %v1356_v22 }
 0x793   : > { %v1879_v31 = vpop.eup %1878 }
 0x794   : > { %v1358_v2 = vmul.f32 %v1879_v31, %v1350_v53 }
 0x796   : > { %v1365_v3 = vmul.f32 %v1672_v28, %v1358_v2 }
 0x798   : > { %v1372_v32 = vadd.f32 %v1673_v30, %v1365_v3 }
 0x79a   : > { %v1374_v20 = vpack.c.bf16 %v1372_v32, %v1372_v32 }
 0x79c   : > { %1730 = vmatmul.mubr.msk.bf16.vlgmr.msra.gmra.mrb[8].mxu0 %vm422_vm1, %v1374_v20 }
 0x86f   : > { %v1435_v33 = vpop.f32.mrb[8].mxu0 }
 0x870   : > { %v1436_v36 = vadd.f32 %v1674_v29, %v1435_v33  ;;  %v1731_v37 = vpop.f32.mrb[9].mxu0 }
 0x871   : > { %v1438_v27 = vpop.f32.mrb[10].mxu0 }
 0x872   : > { %vm1441_vm0 = vcmp.ge.f32.partialorder %v1436_v36, 0.0  ;;  %v1443_v38 = vmul.f32 %v1442_v26, %v1436_v36  ;;  %v1732_v17 = vpop.f32.mrb[11].mxu0 }
 0x874   : > { %v1444_v50 = vsel %vm1441_vm0, %v1436_v36, %v1443_v38 }
 0x875   : > { %v1445_v16 = vpack.c.bf16 %v1444_v50, %v1444_v50 }
 0x877   : > { %1750 = vmatmul.mubr.bf16.vlgmr.msra.gmra.mrb[0].mxu1 %v1445_v16 }
 0x94a   : > { %v1551_v41 = vpop.f32.mrb[0].mxu1 }
 0x94b   : > { %v1552_v43 = vadd.f32 %v1678_v0, %v1551_v41  ;;  %v1751_v39 = vpop.f32.mrb[1].mxu1 }
 0x94c   : > { %v1554_v40 = vpop.f32.mrb[2].mxu1 }
 0x94d   : > { %v1752_v46 = vpop.f32.mrb[3].mxu1  ;;  %v1557_v44 = vadd.f32 %v1552_v43, %v1372_v32 }
 0x94f   : > { %v1558_v8 = vsel %vm422_vm1, %v1557_v44, 0.0 }
 0x950   : > { %1559 = vadd.xlane.f32.xlu0 %v1558_v8 }
 0x9dd   : > { %v1560_v45 = vpop.xlane.xlu0 %1559 }
 0x9de   : > { %v1561_v59 = vmul.f32 0.03125, %v1560_v45 }
 0x9e0   : > { %v1562_v18 = vsub.f32 %v1557_v44, %v1561_v59 }
 0x9e2   : > { %v1563_v49 = vmul.f32 %v1562_v18, %v1562_v18 }
 0x9e4   : > { %v1564_v24 = vsel %vm422_vm1, %v1563_v49, 0.0 }
 0x9e5   : > { %1565 = vadd.xlane.f32.xlu0 %v1564_v24 }
 0xa72   : > { %v1566_v60 = vpop.xlane.xlu0 %1565 }
 0xa73   : > { %v1567_v51 = vmul.f32 0.03125, %v1566_v60 }
 0xa75   : > { %v1568_v21 = vadd.f32 1e-05, %v1567_v51 }
 0xa77   : > { %1880 = vrsqrt.f32 %v1568_v21 }
 0xa81   : > { %v1881_v52 = vpop.eup %1880 }
 0xa82   : > { %v1570_v34 = vmul.f32 %v1881_v52, %v1562_v18 }
 0xa84   : > { %v1571_v55 = vmul.f32 %v1672_v28, %v1570_v34 }
 0xa86   : > { %v1572_v47 = vadd.f32 %v1673_v30, %v1571_v55 }
 0xa88   : > { %1573 = vst.msk [vmem:[%s402_s18] sm:$0xff] %vm422_vm1, %v1572_v47 }
 0xa89   : > { %1926 = shalt.err (!%p1923_p4)
}
 0xa8a   : > { %s1927_s14 = scalar_lea.hbm %s2521_s29, 128  ;;  %s1931_s18 = scalar_lea.hbm %s2577_s11, 256 }
 0xa8b   : > { %p1928_p5 = scmp.ne.s32.totalorder %s2521_s29, %s1927_s14  ;;  %p1932_p0 = scmp.lt.u32.totalorder %s2521_s29, %s2577_s11 }
 0xa8c   : > { %p1933_p1 = scmp.lt.u32.totalorder %s1931_s18, %s1927_s14  ;;  %p1935_p6 = scmp.lt.u32.totalorder %s1927_s14, %s2521_s29 }
 0xa8d   : > { %p1929_p8 = pnand %p1928_p5, %p2587_p11 }
 0xa8e   : > { %p1934_p3 = por %p1933_p1, %p1932_p0 }
 0xa8f   : > { %p1930_p9 = pneg %p1929_p8 }
 0xa90   : > { %p1936_p12 = por %p1935_p6, %p1934_p3 }
 0xa92   : > { %p1937_p13 = pnand %p1936_p12, %p1930_p9 }
 0xa94   : > { %1940 = shalt.err (!%p1937_p13)
}
 0xa95   : > { %1755 = dma.vmem_to_hbm [thread:$0]  (%p2587_p11), %s2523_s25, 128, %s2521_s29, %s1575_s13  }
 0xa96 PF: > { %s1600_s28 = sand.u32 1, %s1967_s19   ;;  %p2588_p7 = scmp.ne.s32.totalorder %s2583_s12, 0 }
 0xa97   : > { %p2589_p10 = scmp.ge.s32.totalorder %s1979_s22, 2  ;;  %s1601_s8 = scalar_lea.sflag [#allocation5], %s1600_s28 }
 0xa99   : > { %p1762_p2 = pnand %p2589_p10, %p2588_p7 }
 0xa9b   : > { %1962 = dma.done.wait (!%p1762_p2), %s1601_s8, 128  }
 0xa9c   : > { %1964 = vsyncadd (!%p1762_p2), %s1601_s8, 4294967168  ;;  %s2590_s17 = sld [smem:[#allocation9_spill]]  ;;  %p25_p4 = scmp.ge.s32.totalorder %s2085_s24, 4  }
 0xa9d   : > { %s2591_s19 = smov %s1971_s20  ;;  %s2592_s20 = smov %s1975_s21 }
 0xa9e   : > { %s2594_s22 = smov %s2085_s24  ;;  %27 = sbr.rel (!%p25_p4) target bundleno = 7 (0x7), region = 109 }
 0xaa2   : > { %s2593_s21 = smov %s2590_s17 }
 0xaa5   :  { %1606 = vsyncpa [#allocation4], 1 }
 0xaa6   :  { %1608 = vsyncpa [#allocation4 + $0x1], 1 }
 0xaa7   :  { %1609 = vsyncpa [#allocation5], 1 }
 0xaa8   :  { %1611 = vsyncpa [#allocation5 + $0x1], 1 }

</bundles_post_ra>
